<compile_context>
chip_gen: v5e
topology: v5e:2x2
jax: 0.10.0
libtpu: 0.0.40
codegen_flags: <defaults>
</compile_context>

<pallas_src>
import jax
import jax.numpy as jnp
from jax import lax
from jax.experimental import pallas as pl
from jax.experimental.pallas import tpu as pltpu


# ---------------------------------------------------------------------------
# Fused kernel: pool (as a matmul) -> matmul -> ReLU -> matmul
# Grid = (B_pad // TB,) over sublane-aligned batch tiles.
# ---------------------------------------------------------------------------
def _fused_kernel(idx_ref, x_ref, w1_ref, b1_ref, w2_ref, b2_ref, o_ref):
    TB, K = idx_ref.shape
    N = x_ref.shape[0]

    # Pooling matrix P[b, n] = (# of times n appears in idx[b, :]) / K.
    # Built with a lane-axis iota compared against the indices; duplicates in
    # indxs are counted with multiplicity, matching mean-of-gathered-rows.
    idx = idx_ref[...]                                        # [TB, K] int32
    iota_n = lax.broadcasted_iota(jnp.int32, (TB, N), 1)      # [TB, N]
    pool = jnp.zeros((TB, N), jnp.float32)
    for k in range(K):                                        # K is small & static
        pool = pool + (iota_n == idx[:, k:k + 1]).astype(jnp.float32)
    pool_mat = pool * (1.0 / K)                               # fold mean scale in

    # pooled = P @ X  on the MXU, f32 accumulation.
    pooled = jnp.dot(pool_mat, x_ref[...], preferred_element_type=jnp.float32)

    # Classifier MLP, fused epilogue (bias adds + ReLU stay in f32 on the VPU).
    h = jnp.dot(pooled, w1_ref[...], preferred_element_type=jnp.float32)
    h = jnp.maximum(h + b1_ref[...], 0.0)
    o = jnp.dot(h, w2_ref[...], preferred_element_type=jnp.float32)
    o_ref[...] = o + b2_ref[...]


def misinformation_forward(x, indxs, params):
    """classifier(aggregator(x, indxs)) as a single fused Pallas call."""
    N, D = x.shape
    B, K = indxs.shape
    w1, b1, w2, b2 = params["w1"], params["b1"], params["w2"], params["b2"]
    H = w1.shape[1]
    C = w2.shape[1]

    TB = 8                                        # sublane-aligned batch tile
    B_pad = ((B + TB - 1) // TB) * TB
    C_pad = ((C + 127) // 128) * 128              # lane-dense output slab

    # Pad indices (extra rows gather row 0; their outputs are discarded) and
    # pad W2/b2 along the class dim so the output block is (TB, 128k).
    idx_pad = jnp.zeros((B_pad, K), jnp.int32).at[:B].set(indxs.astype(jnp.int32))
    w2_pad = jnp.zeros((H, C_pad), w2.dtype).at[:, :C].set(w2)
    b2_pad = jnp.zeros((1, C_pad), b2.dtype).at[:, :C].set(b2)

    # NOTE: for production-sized D/H on v6e/v7x, cast x/w1/w2 to bf16 here and
    # keep preferred_element_type=f32 for the accumulate (~2-4x MXU throughput).
    out_pad = pl.pallas_call(
        _fused_kernel,
        out_shape=jax.ShapeDtypeStruct((B_pad, C_pad), jnp.float32),
        grid=(B_pad // TB,),
        in_specs=[
            pl.BlockSpec((TB, K), lambda i: (i, 0)),      # indices (per B tile)
            pl.BlockSpec((N, D), lambda i: (0, 0)),       # embedding table (resident)
            pl.BlockSpec((D, H), lambda i: (0, 0)),       # W1
            pl.BlockSpec((1, H), lambda i: (0, 0)),       # b1
            pl.BlockSpec((H, C_pad), lambda i: (0, 0)),   # W2 (padded)
            pl.BlockSpec((1, C_pad), lambda i: (0, 0)),   # b2 (padded)
        ],
        out_specs=pl.BlockSpec((TB, C_pad), lambda i: (i, 0)),
        compiler_params=pltpu.CompilerParams(
            dimension_semantics=("parallel",)),
    )(idx_pad, x, w1, b1, w2_pad, b2_pad)

    return out_pad[:B, :C]


if __name__ == "__main__":
    # Small, deterministic shapes.
    N, D = 16, 128      # N post embeddings of width D
    B, K = 2, 4         # B samples, each pooling K embeddings
    H, C = 128, 8       # classifier hidden width and number of classes

    key = jax.random.PRNGKey(0)
    kx, kw1, kb1, kw2, kb2, ki = jax.random.split(key, 6)

    x = jax.random.normal(kx, (N, D), dtype=jnp.float32)
    indxs = jax.random.randint(ki, (B, K), 0, N, dtype=jnp.int32)

    params = {
        "w1": jax.random.normal(kw1, (D, H), dtype=jnp.float32) * 0.05,
        "b1": jax.random.normal(kb1, (1, H), dtype=jnp.float32) * 0.01,
        "w2": jax.random.normal(kw2, (H, C), dtype=jnp.float32) * 0.05,
        "b2": jax.random.normal(kb2, (1, C), dtype=jnp.float32) * 0.01,
    }

    out = misinformation_forward(x, indxs, params)
    jax.block_until_ready(out)

    # Reference check in plain JAX (same semantics as the PyTorch forward).
    pooled_ref = jnp.mean(x[indxs], axis=1)
    ref = jnp.maximum(pooled_ref @ params["w1"] + params["b1"], 0.0) @ params["w2"] + params["b2"]
    assert out.shape == (B, C)
    assert jnp.allclose(out, ref, atol=1e-3, rtol=1e-3)

    print("KERNEL_OK")
</pallas_src>

<mosaic_0001>
module attributes {stable_mosaic.version = 11 : i64} {
  func.func @_fused_kernel(%arg0: i32, %arg1: memref<8x4xi32, #tpu.memory_space<vmem>>, %arg2: memref<16x128xf32, #tpu.memory_space<vmem>>, %arg3: memref<128x128xf32, #tpu.memory_space<vmem>>, %arg4: memref<1x128xf32, #tpu.memory_space<vmem>>, %arg5: memref<128x128xf32, #tpu.memory_space<vmem>>, %arg6: memref<1x128xf32, #tpu.memory_space<vmem>>, %arg7: memref<8x128xf32, #tpu.memory_space<vmem>>) attributes {dimension_semantics = [#tpu.dimension_semantics<parallel>], iteration_bounds = array<i64: 1>, scalar_prefetch = 0 : i64, scratch_operands = 0 : i64, tpu.core_type = #tpu.core_type<tc>, window_params = [{transform_indices = @transform_0, window_bounds = array<i64: 8, 4>}, {pipeline_mode = #tpu.pipeline_mode<synchronous>, transform_indices = @transform_1, window_bounds = array<i64: 16, 128>}, {pipeline_mode = #tpu.pipeline_mode<synchronous>, transform_indices = @transform_2, window_bounds = array<i64: 128, 128>}, {pipeline_mode = #tpu.pipeline_mode<synchronous>, transform_indices = @transform_3, window_bounds = array<i64: 1, 128>}, {pipeline_mode = #tpu.pipeline_mode<synchronous>, transform_indices = @transform_4, window_bounds = array<i64: 128, 128>}, {pipeline_mode = #tpu.pipeline_mode<synchronous>, transform_indices = @transform_5, window_bounds = array<i64: 1, 128>}, {transform_indices = @transform_6, window_bounds = array<i64: 8, 128>}]} {
    %c0 = arith.constant 0 : index
    %c0_0 = arith.constant 0 : index
    %0 = vector.load %arg1[%c0, %c0_0] : memref<8x4xi32, #tpu.memory_space<vmem>>, vector<8x4xi32>
    %1 = tpu.iota {dimensions = array<i32: 1>} : vector<8x16xi32>
    %cst = arith.constant 0.000000e+00 : f32
    %2 = vector.broadcast %cst : f32 to vector<8x16xf32>
    %3 = vector.extract_strided_slice %0 {offsets = [0, 0], sizes = [8, 1], strides = [1, 1]} : vector<8x4xi32> to vector<8x1xi32>
    %4 = vector.broadcast %3 : vector<8x1xi32> to vector<8x16xi32>
    %5 = arith.cmpi eq, %1, %4 : vector<8x16xi32>
    %6 = arith.extui %5 : vector<8x16xi1> to vector<8x16xi32>
    %7 = arith.sitofp %6 : vector<8x16xi32> to vector<8x16xf32>
    %8 = arith.addf %2, %7 : vector<8x16xf32>
    %9 = vector.extract_strided_slice %0 {offsets = [0, 1], sizes = [8, 1], strides = [1, 1]} : vector<8x4xi32> to vector<8x1xi32>
    %10 = vector.broadcast %9 : vector<8x1xi32> to vector<8x16xi32>
    %11 = arith.cmpi eq, %1, %10 : vector<8x16xi32>
    %12 = arith.extui %11 : vector<8x16xi1> to vector<8x16xi32>
    %13 = arith.sitofp %12 : vector<8x16xi32> to vector<8x16xf32>
    %14 = arith.addf %8, %13 : vector<8x16xf32>
    %15 = vector.extract_strided_slice %0 {offsets = [0, 2], sizes = [8, 1], strides = [1, 1]} : vector<8x4xi32> to vector<8x1xi32>
    %16 = vector.broadcast %15 : vector<8x1xi32> to vector<8x16xi32>
    %17 = arith.cmpi eq, %1, %16 : vector<8x16xi32>
    %18 = arith.extui %17 : vector<8x16xi1> to vector<8x16xi32>
    %19 = arith.sitofp %18 : vector<8x16xi32> to vector<8x16xf32>
    %20 = arith.addf %14, %19 : vector<8x16xf32>
    %21 = vector.extract_strided_slice %0 {offsets = [0, 3], sizes = [8, 1], strides = [1, 1]} : vector<8x4xi32> to vector<8x1xi32>
    %22 = vector.broadcast %21 : vector<8x1xi32> to vector<8x16xi32>
    %23 = arith.cmpi eq, %1, %22 : vector<8x16xi32>
    %24 = arith.extui %23 : vector<8x16xi1> to vector<8x16xi32>
    %25 = arith.sitofp %24 : vector<8x16xi32> to vector<8x16xf32>
    %26 = arith.addf %20, %25 : vector<8x16xf32>
    %cst_1 = arith.constant 2.500000e-01 : f32
    %27 = vector.broadcast %cst_1 : f32 to vector<8x16xf32>
    %28 = arith.mulf %26, %27 : vector<8x16xf32>
    %c0_2 = arith.constant 0 : index
    %c0_3 = arith.constant 0 : index
    %29 = vector.load %arg2[%c0_2, %c0_3] : memref<16x128xf32, #tpu.memory_space<vmem>>, vector<16x128xf32>
    %cst_4 = arith.constant dense<0.000000e+00> : vector<8x128xf32>
    %30 = tpu.matmul %28, %29, %cst_4 {dimension_numbers = #tpu.dot_dimension_numbers<[1], [0], [0], [1], [0, 0, 1, 1], [], []>} : vector<8x16xf32>, vector<16x128xf32>, vector<8x128xf32> -> vector<8x128xf32>
    %c0_5 = arith.constant 0 : index
    %c0_6 = arith.constant 0 : index
    %31 = vector.load %arg3[%c0_5, %c0_6] : memref<128x128xf32, #tpu.memory_space<vmem>>, vector<128x128xf32>
    %cst_7 = arith.constant dense<0.000000e+00> : vector<8x128xf32>
    %32 = tpu.matmul %30, %31, %cst_7 {dimension_numbers = #tpu.dot_dimension_numbers<[1], [0], [0], [1], [0, 0, 1, 1], [], []>} : vector<8x128xf32>, vector<128x128xf32>, vector<8x128xf32> -> vector<8x128xf32>
    %c0_8 = arith.constant 0 : index
    %c0_9 = arith.constant 0 : index
    %33 = vector.load %arg4[%c0_8, %c0_9] : memref<1x128xf32, #tpu.memory_space<vmem>>, vector<1x128xf32>
    %34 = vector.broadcast %33 : vector<1x128xf32> to vector<8x128xf32>
    %35 = arith.addf %32, %34 : vector<8x128xf32>
    %cst_10 = arith.constant 0.000000e+00 : f32
    %36 = vector.broadcast %cst_10 : f32 to vector<8x128xf32>
    %37 = arith.maximumf %35, %36 : vector<8x128xf32>
    %c0_11 = arith.constant 0 : index
    %c0_12 = arith.constant 0 : index
    %38 = vector.load %arg5[%c0_11, %c0_12] : memref<128x128xf32, #tpu.memory_space<vmem>>, vector<128x128xf32>
    %cst_13 = arith.constant dense<0.000000e+00> : vector<8x128xf32>
    %39 = tpu.matmul %37, %38, %cst_13 {dimension_numbers = #tpu.dot_dimension_numbers<[1], [0], [0], [1], [0, 0, 1, 1], [], []>} : vector<8x128xf32>, vector<128x128xf32>, vector<8x128xf32> -> vector<8x128xf32>
    %c0_14 = arith.constant 0 : index
    %c0_15 = arith.constant 0 : index
    %40 = vector.load %arg6[%c0_14, %c0_15] : memref<1x128xf32, #tpu.memory_space<vmem>>, vector<1x128xf32>
    %41 = vector.broadcast %40 : vector<1x128xf32> to vector<8x128xf32>
    %42 = arith.addf %39, %41 : vector<8x128xf32>
    %c0_16 = arith.constant 0 : index
    %c0_17 = arith.constant 0 : index
    %43 = vector.load %arg7[%c0_16, %c0_17] : memref<8x128xf32, #tpu.memory_space<vmem>>, vector<8x128xf32>
    tpu.vector_store %arg7[%c0_16, %c0_17], %42 {strides = array<i32>} : memref<8x128xf32, #tpu.memory_space<vmem>>, vector<8x128xf32>,
    return
  }
  func.func @transform_0(%arg0: i32) -> (i32, i32) {
    %c0_i32 = arith.constant 0 : i32
    %c0_i32_0 = arith.constant 0 : i32
    return %arg0, %c0_i32 : i32, i32
  }
  func.func @transform_1(%arg0: i32) -> (i32, i32) {
    %c0_i32 = arith.constant 0 : i32
    %c0_i32_0 = arith.constant 0 : i32
    %c0_i32_1 = arith.constant 0 : i32
    return %c0_i32, %c0_i32_0 : i32, i32
  }
  func.func @transform_2(%arg0: i32) -> (i32, i32) {
    %c0_i32 = arith.constant 0 : i32
    %c0_i32_0 = arith.constant 0 : i32
    %c0_i32_1 = arith.constant 0 : i32
    return %c0_i32, %c0_i32_0 : i32, i32
  }
  func.func @transform_3(%arg0: i32) -> (i32, i32) {
    %c0_i32 = arith.constant 0 : i32
    %c0_i32_0 = arith.constant 0 : i32
    %c0_i32_1 = arith.constant 0 : i32
    return %c0_i32, %c0_i32_0 : i32, i32
  }
  func.func @transform_4(%arg0: i32) -> (i32, i32) {
    %c0_i32 = arith.constant 0 : i32
    %c0_i32_0 = arith.constant 0 : i32
    %c0_i32_1 = arith.constant 0 : i32
    return %c0_i32, %c0_i32_0 : i32, i32
  }
  func.func @transform_5(%arg0: i32) -> (i32, i32) {
    %c0_i32 = arith.constant 0 : i32
    %c0_i32_0 = arith.constant 0 : i32
    %c0_i32_1 = arith.constant 0 : i32
    return %c0_i32, %c0_i32_0 : i32, i32
  }
  func.func @transform_6(%arg0: i32) -> (i32, i32) {
    %c0_i32 = arith.constant 0 : i32
    %c0_i32_0 = arith.constant 0 : i32
    return %arg0, %c0_i32 : i32, i32
  }
}

</mosaic_0001>

<bundles_post_ra>
// kernel: tpu_custom_call.1
= control target key start
LH: loop header
LB: loop body
LE: loop exit
PB: predicated region body
PF: predicated region fallthrough
CT: control target
= control target key end

     0   :  { %11 = vsyncpa [#allocation3], 0  ;;  %s421_s0 = inlined_call_operand.vmem [shape: s32[8,4], index: 0, kind: input, shape index: {}]   ;;  %s422_s1 = inlined_call_operand.hbm [shape: f32[16,128], index: 1, kind: input, shape index: {}]   ;;  %s423_s2 = inlined_call_operand.hbm [shape: f32[128,128], index: 2, kind: input, shape index: {}]   ;;  %s424_s3 = inlined_call_operand.vmem [shape: f32[1,128], index: 3, kind: input, shape index: {}]   ;;  %s425_s4 = inlined_call_operand.hbm [shape: f32[128,128], index: 4, kind: input, shape index: {}]   ;;  %s426_s5 = inlined_call_operand.vmem [shape: f32[1,128], index: 5, kind: input, shape index: {}]   ;;  %s427_s6 = inlined_call_operand.hbm [shape: f32[8,128], index: 6, kind: output, shape index: {}]  }
   0x1   :  { %12 = vsyncpa [#allocation6], 0 }
   0x2   :  { %13 = vsyncpa [#allocation4], 0  ;;  %s33_s23 = sshll.u32 %s423_s2, 4  ;;  %s354_s24 = smov [#allocation5]   ;;  %s34_s23 = int_to_ptr.hbm [resolvable:$true] %s33_s23 }
   0x3   :  { %s35_s25 = sshll.u32 %s354_s24, 4  ;;  %s20_s28 = sshll.u32 %s422_s1, 4  ;;  %s36_s25 = int_to_ptr.vmem [resolvable:$true] %s35_s25  ;;  %s21_s28 = int_to_ptr.hbm [resolvable:$true] %s20_s28 }
   0x4   :  { %s355_s29 = smov 128   ;;  %s356_s30 = smov 8  }
   0x5   :  { %41 = dma.hbm_to_vmem [thread:$0]  %s34_s23, 2048, %s36_s25, [#allocation6], %s355_s29, %s355_s29, %s356_s30  }
   0x6   :  { %s357_s7 = smov [#allocation2]   ;;  %s48_s11 = sshll.u32 %s425_s4, 4  ;;  %s49_s11 = int_to_ptr.hbm [resolvable:$true] %s48_s11 }
   0x7   :  { %s22_s8 = sshll.u32 %s357_s7, 4  ;;  %s358_s2 = smov [#allocation7]   ;;  %s23_s8 = int_to_ptr.vmem [resolvable:$true] %s22_s8 }
   0x8   :  { %28 = dma.hbm_to_vmem [thread:$0]  %s21_s28, 256, %s23_s8, [#allocation3], %s355_s29, %s355_s29, %s356_s30  }
   0x9   :  { %s50_s12 = sshll.u32 %s358_s2, 4  ;;  %s51_s12 = int_to_ptr.vmem [resolvable:$true] %s50_s12 }
   0xa   :  { %56 = dma.hbm_to_vmem [thread:$0]  %s49_s11, 2048, %s51_s12, [#allocation6], %s355_s29, %s355_s29, %s356_s30  }
   0xb   :  { %348 = dma.done.wait [#allocation3], 256  }
   0xc   :  { %349 = vsyncadd [#allocation3], 4294967040 }
   0xd   :  { %350 = dma.done.wait [#allocation6], 4096  }
   0xe   :  { %351 = vsyncadd [#allocation6], 4294963200  ;;  %v359_v0 = vmov 0   ;;  %v360_v1 = vmov 2   ;;  %v71_v2 = vld [vmem:[%s421_s0] sm:$0xff]  ;;  %v361_v3 = vmov 1   ;;  %v72_v14 = vlaneseq }
   0xf   :  { %245 = vset.pattern.permute.xlu0 %v359_v0  ;;  %247 = vset.pattern.permute.xlu1 %v360_v1  ;;  %v362_v4 = vmov 3   ;;  %v104_v5 = vld [vmem:[#allocation2 + $0x8] sm:$0xff]  ;;  %v103_v6 = vld [vmem:[#allocation2] sm:$0xff]  ;;  %v142_v9 = vld [vmem:[#allocation5 + $0x68] sm:$0xff]  ;;  %v363_v26 = vmov 0.0   ;;  %vm105_vm4 = vcmask 130048  }
  0x10   :  { %75 = vperm.xlu0 %245, %v71_v2   ;;  %89 = vperm.xlu1 %247, %v71_v2   ;;  %v144_v7 = vld [vmem:[#allocation5 + $0x78] sm:$0xff]  ;;  %v143_v8 = vld [vmem:[#allocation5 + $0x70] sm:$0xff]  ;;  %v141_v10 = vld [vmem:[#allocation5 + $0x60] sm:$0xff]  ;;  %v73_v19 = vand.u32 127, %v72_v14  ;;  %s364_s16 = smov [#allocation8]   ;;  %s218_s20 = sshll.u32 %s427_s6, 4  ;;  %s219_s20 = int_to_ptr.hbm [resolvable:$true] %s218_s20 }
  0x11   :  { %123 = vmatpush.msra.mxu0 %v104_v5  ;;  %149 = vmatpush.msra.mxu1 %v144_v7  ;;  %v140_v11 = vld [vmem:[#allocation5 + $0x58] sm:$0xff]  ;;  %v139_v12 = vld [vmem:[#allocation5 + $0x50] sm:$0xff]  ;;  %v138_v13 = vld [vmem:[#allocation5 + $0x48] sm:$0xff]  ;;  %s216_s17 = sshll.u32 %s364_s16, 4  ;;  %s217_s17 = int_to_ptr.vmem [resolvable:$true] %s216_s17 }
  0x12   :  { %v137_v17 = vld [vmem:[#allocation5 + $0x40] sm:$0xff]  ;;  %v136_v18 = vld [vmem:[#allocation5 + $0x38] sm:$0xff]  ;;  %v135_v20 = vld [vmem:[#allocation5 + $0x30] sm:$0xff] }
  0x13   :  { %124 = vmatpush.msra.mxu0 %v103_v6  ;;  %150 = vmatpush.msra.mxu1 %v143_v8  ;;  %v134_v21 = vld [vmem:[#allocation5 + $0x28] sm:$0xff]  ;;  %v133_v22 = vld [vmem:[#allocation5 + $0x20] sm:$0xff]  ;;  %v132_v25 = vld [vmem:[#allocation5 + $0x18] sm:$0xff] }
  0x14   :  { %v131_v30 = vld [vmem:[#allocation5 + $0x10] sm:$0xff]  ;;  %v130_v34 = vld [vmem:[#allocation5 + $0x8] sm:$0xff]  ;;  %v129_v37 = vld [vmem:[#allocation5] sm:$0xff] }
  0x15   :  { %151 = vmatpush.msra.mxu1 %v142_v9  ;;  %v185_v38 = vld [vmem:[#allocation7 + $0x78] sm:$0xff]  ;;  %v184_v39 = vld [vmem:[#allocation7 + $0x70] sm:$0xff]  ;;  %v183_v40 = vld [vmem:[#allocation7 + $0x68] sm:$0xff] }
  0x16   :  { %190 = vmatpush.msra.mxu2 %v185_v38  ;;  %v182_v41 = vld [vmem:[#allocation7 + $0x60] sm:$0xff]  ;;  %v181_v42 = vld [vmem:[#allocation7 + $0x58] sm:$0xff]  ;;  %v180_v43 = vld [vmem:[#allocation7 + $0x50] sm:$0xff] }
  0x17   :  { %152 = vmatpush.msra.mxu1 %v141_v10  ;;  %v179_v44 = vld [vmem:[#allocation7 + $0x48] sm:$0xff]  ;;  %v178_v45 = vld [vmem:[#allocation7 + $0x40] sm:$0xff]  ;;  %v177_v46 = vld [vmem:[#allocation7 + $0x38] sm:$0xff] }
  0x18   :  { %246 = vset.pattern.permute.xlu0 %v361_v3  ;;  %248 = vset.pattern.permute.xlu1 %v362_v4  ;;  %v176_v47 = vld [vmem:[#allocation7 + $0x30] sm:$0xff]  ;;  %v175_v48 = vld [vmem:[#allocation7 + $0x28] sm:$0xff]  ;;  %v174_v49 = vld [vmem:[#allocation7 + $0x20] sm:$0xff] }
  0x19   :  { %82 = vperm.xlu0 %246, %v71_v2   ;;  %96 = vperm.xlu1 %248, %v71_v2   ;;  %v173_v50 = vld [vmem:[#allocation7 + $0x18] sm:$0xff]  ;;  %v172_v52 = vld [vmem:[#allocation7 + $0x10] sm:$0xff]  ;;  %v171_v53 = vld [vmem:[#allocation7 + $0x8] sm:$0xff] }
  0x1a   :  { %153 = vmatpush.msra.mxu1 %v140_v11  ;;  %191 = vmatpush.msra.mxu2 %v184_v39  ;;  %v170_v54 = vld [vmem:[#allocation7] sm:$0xff]  ;;  %v250_v55 = vld [vmem:[%s424_s3] ss:$0 sm:$0xff] }
  0x1b   :  { %v251_v59 = vld [vmem:[%s426_s5] ss:$0 sm:$0xff] }
  0x1c   :  { %154 = vmatpush.msra.mxu1 %v139_v12  ;;  %192 = vmatpush.msra.mxu2 %v183_v40 }
  0x1e   :  { %155 = vmatpush.msra.mxu1 %v138_v13  ;;  %193 = vmatpush.msra.mxu2 %v182_v41 }
  0x20   :  { %156 = vmatpush.msra.mxu1 %v137_v17  ;;  %194 = vmatpush.msra.mxu2 %v181_v42 }
  0x21   :  { %249 = vset.pattern.permute.xlu0 %v362_v4 }
  0x22   :  { %157 = vmatpush.msra.mxu1 %v136_v18  ;;  %195 = vmatpush.msra.mxu2 %v180_v43 }
  0x24   :  { %158 = vmatpush.msra.mxu1 %v135_v20  ;;  %196 = vmatpush.msra.mxu2 %v179_v44 }
  0x26   :  { %159 = vmatpush.msra.mxu1 %v134_v21  ;;  %197 = vmatpush.msra.mxu2 %v178_v45 }
  0x28   :  { %160 = vmatpush.msra.mxu1 %v133_v22  ;;  %198 = vmatpush.msra.mxu2 %v177_v46 }
  0x2a   :  { %161 = vmatpush.msra.mxu1 %v132_v25  ;;  %199 = vmatpush.msra.mxu2 %v176_v47 }
  0x2c   :  { %162 = vmatpush.msra.mxu1 %v131_v30  ;;  %200 = vmatpush.msra.mxu2 %v175_v48 }
  0x2e   :  { %163 = vmatpush.msra.mxu1 %v130_v34  ;;  %201 = vmatpush.msra.mxu2 %v174_v49 }
  0x30   :  { %164 = vmatpush.msra.mxu1 %v129_v37  ;;  %202 = vmatpush.msra.mxu2 %v173_v50 }
  0x32   :  { %203 = vmatpush.msra.mxu2 %v172_v52 }
  0x34   :  { %204 = vmatpush.msra.mxu2 %v171_v53 }
  0x36   :  { %205 = vmatpush.msra.mxu2 %v170_v54 }
  0x82   :  { %v76_v15 = vpop.permute.xlu0 %75  ;;  %v90_v16 = vpop.permute.xlu1 %89 }
  0x83   :  { %vm77_vm0 = vcmp.eq.s32.totalorder %v73_v19, %v76_v15  ;;  %vm91_vm1 = vcmp.eq.s32.totalorder %v73_v19, %v90_v16 }
  0x84   :  { %v229_v27 = vsel %vm77_vm0, 1.0, %v363_v26  ;;  %v231_v31 = vsel %vm91_vm1, 1.0, %v363_v26 }
  0x8b   :  { %v83_v23 = vpop.permute.xlu0 %82  ;;  %v97_v24 = vpop.permute.xlu1 %96 }
  0x8c   :  { %vm84_vm2 = vcmp.eq.s32.totalorder %v73_v19, %v83_v23  ;;  %vm98_vm3 = vcmp.eq.s32.totalorder %v73_v19, %v97_v24 }
  0x8d   :  { %v230_v28 = vsel %vm84_vm2, 1.0, %v363_v26  ;;  %v232_v32 = vsel %vm98_vm3, 1.0, %v363_v26 }
  0x8e   :  { %v87_v29 = vadd.f32 %v230_v28, %v229_v27 }
  0x90   :  { %v94_v33 = vadd.f32 %v231_v31, %v87_v29 }
  0x92   :  { %v101_v35 = vadd.f32 %v232_v32, %v94_v33 }
  0x94   :  { %v102_v36 = vmul.f32 0.25, %v101_v35 }
  0x96   :  { %233 = vmatmul.msk.f32.vlgmr.msra.gmra.mxu0 %vm105_vm4, %v102_v36 }
 0x113   :  { %v126_v51 = vpop.f32.mrf.mxu0 }
 0x114   :  { %165 = vmatmul.f32.vlgmr.msra.gmra.mxu1 %v126_v51 }
 0x191   :  { %v166_v56 = vpop.f32.mrf.mxu1 }
 0x192   :  { %v167_v57 = vadd.f32 %v250_v55, %v166_v56 }
 0x194   :  { %v169_v58 = vmax.f32 %v167_v57, 0.0 }
 0x196   :  { %206 = vmatmul.f32.vlgmr.msra.gmra.mxu2 %v169_v58 }
 0x219   :  { %v207_v60 = vpop.f32.mrf.mxu2 }
 0x21a   :  { %v208_v61 = vadd.f32 %v251_v59, %v207_v60 }
 0x21c   :  { %210 = vst [vmem:[#allocation8] sm:$0xff] %v208_v61 }
 0x21d   :  { %221 = dma.vmem_to_hbm [thread:$0]  %s217_s17, 128, %s219_s20, [#allocation4]  }
 0x21e   :  { %352 = dma.done.wait [#allocation4], 128  }
 0x21f   :  { %353 = vsyncadd [#allocation4], 4294967168 }
 0x220   :  { %226 = vsyncpa [#allocation3], 1 }
 0x221   :  { %227 = vsyncpa [#allocation6], 1 }
 0x222   :  { %228 = vsyncpa [#allocation4], 1 }

</bundles_post_ra>
